<compile_context>
chip_gen: v5e
topology: v5e:2x2
jax: 0.10.0
libtpu: 0.0.40
codegen_flags: <defaults>
</compile_context>

<pallas_src>
import functools

import jax
import jax.numpy as jnp
from jax.experimental import pallas as pl
from jax.experimental.pallas import tpu as pltpu

_LANE = 128          # lane width: pad class axis to a multiple of this
_SUBLANE = 8         # sublane: batch tile must be a multiple of this
_NEG_BIG = -1e30     # bias for padded class columns; exp() underflows to 0 in f32


def _round_up(x, m):
    return (x + m - 1) // m * m


def logreg_kernel(x_ref, w_ref, b_ref, o_ref):
    # MXU matmul with f32 accumulation, bias add + numerically stable log-softmax.
    logits = jnp.dot(x_ref[...], w_ref[...],
                     preferred_element_type=jnp.float32) + b_ref[...]
    m = jnp.max(logits, axis=-1, keepdims=True)                        # XLU reduce
    shifted = logits - m
    lse = jnp.log(jnp.sum(jnp.exp(shifted), axis=-1, keepdims=True))   # EUP exp/log
    o_ref[...] = (shifted - lse).astype(o_ref.dtype)


def prepare_params(weight, bias):
    """One-time param prep (hoisted out of the per-call hot path).

    weight: [nb_classes, ft_in] (PyTorch layout), bias: [nb_classes].
    Returns w_t_pad: [ft_in, N_pad], b_pad: [1, N_pad] with N_pad a multiple of 128.
    Padded class columns have zero weights and a very negative bias so the
    in-kernel log-softmax over the padded width ignores them exactly.
    """
    nb_classes, ft_in = weight.shape
    n_pad = _round_up(nb_classes, _LANE)
    w_t_pad = jnp.zeros((ft_in, n_pad), dtype=jnp.float32)
    w_t_pad = w_t_pad.at[:, :nb_classes].set(weight.T.astype(jnp.float32))
    b_pad = jnp.full((1, n_pad), _NEG_BIG, dtype=jnp.float32)
    b_pad = b_pad.at[0, :nb_classes].set(bias.astype(jnp.float32))
    return w_t_pad, b_pad


def _pick_tile_b(b_rows, ft_in, n_pad, x_itemsize, vmem_budget_bytes):
    """Largest batch tile (multiple of 8, capped at 1024) fitting the VMEM budget."""
    tile = _round_up(min(1024, max(b_rows, _SUBLANE)), _SUBLANE)
    while tile > _SUBLANE:
        # double-buffered x tile + double-buffered f32 out tile
        # + (conservatively double-buffered) resident weight/bias.
        need = (2 * tile * ft_in * x_itemsize
                + 2 * tile * n_pad * 4
                + 2 * ft_in * n_pad * 4
                + 2 * n_pad * 4)
        if need <= vmem_budget_bytes:
            break
        tile -= _SUBLANE
    return max(tile, _SUBLANE)


@functools.partial(jax.jit, static_argnames=("nb_classes",))
def logreg_forward(seq, w_t_pad, b_pad, *, nb_classes):
    """seq: [..., ft_in] f32; w_t_pad/b_pad from prepare_params.

    Returns log_softmax(seq @ W.T + b, axis=-1) with shape [..., nb_classes].
    """
    ft_in = seq.shape[-1]
    lead_shape = seq.shape[:-1]
    seq2d = seq.reshape(-1, ft_in)
    B = seq2d.shape[0]
    n_pad = w_t_pad.shape[1]

    tile_b = _pick_tile_b(B, ft_in, n_pad, seq2d.dtype.itemsize,
                          vmem_budget_bytes=32 * 1024 * 1024)
    b_padded = _round_up(max(B, tile_b), tile_b)
    if b_padded != B:
        # Ragged last tile: pad with zero rows; padded rows are sliced off below.
        seq2d = jnp.pad(seq2d, ((0, b_padded - B), (0, 0)))

    grid = (b_padded // tile_b,)

    bytes_accessed = (b_padded * ft_in * seq2d.dtype.itemsize        # read x
                      + w_t_pad.size * w_t_pad.dtype.itemsize        # read W
                      + b_pad.size * 4                               # read b
                      + b_padded * n_pad * 4)                        # write out
    cost = pl.CostEstimate(
        flops=2 * b_padded * ft_in * n_pad,
        transcendentals=b_padded * (n_pad + 1),   # exp per element + log per row
        bytes_accessed=bytes_accessed,
    )

    out = pl.pallas_call(
        logreg_kernel,
        out_shape=jax.ShapeDtypeStruct((b_padded, n_pad), jnp.float32),
        grid=grid,
        in_specs=[
            pl.BlockSpec((tile_b, ft_in), lambda i: (i, 0)),   # streamed batch tile
            pl.BlockSpec((ft_in, n_pad), lambda i: (0, 0)),    # VMEM-resident weight
            pl.BlockSpec((1, n_pad), lambda i: (0, 0)),        # VMEM-resident bias
        ],
        out_specs=pl.BlockSpec((tile_b, n_pad), lambda i: (i, 0)),
        compiler_params=pltpu.CompilerParams(
            dimension_semantics=("parallel",),      # megacore on v7x, no-op elsewhere
            vmem_limit_bytes=48 * 1024 * 1024,      # headroom on v7x's 64 MiB VMEM
        ),
        cost_estimate=cost,
    )(seq2d, w_t_pad, b_pad)

    # Drop batch padding and lane-padding of the class axis; restore leading dims.
    out = out[:B, :nb_classes]
    return out.reshape(*lead_shape, nb_classes)


def init_params(key, ft_in, nb_classes):
    # Matches PyTorch: xavier_uniform_ on weight [nb_classes, ft_in], bias = 0.
    bound = jnp.sqrt(6.0 / (ft_in + nb_classes))
    weight = jax.random.uniform(key, (nb_classes, ft_in),
                                dtype=jnp.float32, minval=-bound, maxval=bound)
    bias = jnp.zeros((nb_classes,), dtype=jnp.float32)
    return weight, bias


if __name__ == "__main__":
    B, ft_in, nb_classes = 8, 32, 16
    key = jax.random.PRNGKey(0)
    k_x, k_w = jax.random.split(key)

    seq = jax.random.normal(k_x, (B, ft_in), dtype=jnp.float32)
    weight, bias = init_params(k_w, ft_in, nb_classes)

    # One-time param prep (transpose + lane-pad), outside the per-batch hot path.
    w_t_pad, b_pad = prepare_params(weight, bias)

    out = logreg_forward(seq, w_t_pad, b_pad, nb_classes=nb_classes)
    jax.block_until_ready(out)

    # Sanity check against plain-JAX reference.
    ref = jax.nn.log_softmax(seq @ weight.T + bias, axis=-1)
    assert out.shape == (B, nb_classes), f"bad shape {out.shape}"
    assert jnp.allclose(out, ref, atol=1e-5), "mismatch vs reference"

    print("KERNEL_OK")
</pallas_src>

<mosaic_0001>
module attributes {stable_mosaic.version = 11 : i64} {
  func.func @logreg_kernel(%arg0: i32, %arg1: memref<8x32xf32, #tpu.memory_space<vmem>>, %arg2: memref<32x128xf32, #tpu.memory_space<vmem>>, %arg3: memref<1x128xf32, #tpu.memory_space<vmem>>, %arg4: memref<8x128xf32, #tpu.memory_space<vmem>>) attributes {dimension_semantics = [#tpu.dimension_semantics<parallel>], iteration_bounds = array<i64: 1>, scalar_prefetch = 0 : i64, scratch_operands = 0 : i64, tpu.core_type = #tpu.core_type<tc>, window_params = [{transform_indices = @transform_0, window_bounds = array<i64: 8, 32>}, {pipeline_mode = #tpu.pipeline_mode<synchronous>, transform_indices = @transform_1, window_bounds = array<i64: 32, 128>}, {pipeline_mode = #tpu.pipeline_mode<synchronous>, transform_indices = @transform_2, window_bounds = array<i64: 1, 128>}, {transform_indices = @transform_3, window_bounds = array<i64: 8, 128>}]} {
    %c0 = arith.constant 0 : index
    %c0_0 = arith.constant 0 : index
    %0 = vector.load %arg1[%c0, %c0_0] : memref<8x32xf32, #tpu.memory_space<vmem>>, vector<8x32xf32>
    %c0_1 = arith.constant 0 : index
    %c0_2 = arith.constant 0 : index
    %1 = vector.load %arg2[%c0_1, %c0_2] : memref<32x128xf32, #tpu.memory_space<vmem>>, vector<32x128xf32>
    %cst = arith.constant dense<0.000000e+00> : vector<8x128xf32>
    %2 = tpu.matmul %0, %1, %cst {dimension_numbers = #tpu.dot_dimension_numbers<[1], [0], [0], [1], [0, 0, 1, 1], [], []>} : vector<8x32xf32>, vector<32x128xf32>, vector<8x128xf32> -> vector<8x128xf32>
    %c0_3 = arith.constant 0 : index
    %c0_4 = arith.constant 0 : index
    %3 = vector.load %arg3[%c0_3, %c0_4] : memref<1x128xf32, #tpu.memory_space<vmem>>, vector<1x128xf32>
    %4 = vector.broadcast %3 : vector<1x128xf32> to vector<8x128xf32>
    %5 = arith.addf %2, %4 : vector<8x128xf32>
    %cst_5 = arith.constant dense<0xFF800000> : vector<8xf32>
    %6 = vector.multi_reduction <maximumf>, %5, %cst_5 [1] : vector<8x128xf32> to vector<8xf32>
    %7 = vector.shape_cast %6 : vector<8xf32> to vector<8x1xf32>
    %8 = vector.broadcast %7 : vector<8x1xf32> to vector<8x128xf32>
    %9 = arith.subf %5, %8 : vector<8x128xf32>
    %10 = math.exp %9 : vector<8x128xf32>
    %cst_6 = arith.constant dense<0.000000e+00> : vector<8xf32>
    %11 = vector.multi_reduction <add>, %10, %cst_6 [1] : vector<8x128xf32> to vector<8xf32>
    %12 = vector.shape_cast %11 : vector<8xf32> to vector<8x1xf32>
    %13 = math.log %12 : vector<8x1xf32>
    %14 = vector.broadcast %13 : vector<8x1xf32> to vector<8x128xf32>
    %15 = arith.subf %9, %14 : vector<8x128xf32>
    %c0_7 = arith.constant 0 : index
    %c0_8 = arith.constant 0 : index
    %16 = vector.load %arg4[%c0_7, %c0_8] : memref<8x128xf32, #tpu.memory_space<vmem>>, vector<8x128xf32>
    tpu.vector_store %arg4[%c0_7, %c0_8], %15 {strides = array<i32>} : memref<8x128xf32, #tpu.memory_space<vmem>>, vector<8x128xf32>,
    return
  }
  func.func @transform_0(%arg0: i32) -> (i32, i32) {
    %c0_i32 = arith.constant 0 : i32
    %c0_i32_0 = arith.constant 0 : i32
    return %arg0, %c0_i32 : i32, i32
  }
  func.func @transform_1(%arg0: i32) -> (i32, i32) {
    %c0_i32 = arith.constant 0 : i32
    %c0_i32_0 = arith.constant 0 : i32
    %c0_i32_1 = arith.constant 0 : i32
    return %c0_i32, %c0_i32_0 : i32, i32
  }
  func.func @transform_2(%arg0: i32) -> (i32, i32) {
    %c0_i32 = arith.constant 0 : i32
    %c0_i32_0 = arith.constant 0 : i32
    %c0_i32_1 = arith.constant 0 : i32
    return %c0_i32, %c0_i32_0 : i32, i32
  }
  func.func @transform_3(%arg0: i32) -> (i32, i32) {
    %c0_i32 = arith.constant 0 : i32
    %c0_i32_0 = arith.constant 0 : i32
    return %arg0, %c0_i32 : i32, i32
  }
}

</mosaic_0001>

<bundles_post_ra>
// kernel: logreg_forward.1
= control target key start
LH: loop header
LB: loop body
LE: loop exit
PB: predicated region body
PF: predicated region fallthrough
CT: control target
= control target key end

     0   :  { %8 = vsyncpa [#allocation3], 0  ;;  %s233_s0 = inlined_call_operand.hbm [shape: f32[8,32], index: 0, kind: input, shape index: {}]   ;;  %s234_s1 = inlined_call_operand.hbm [shape: f32[32,128], index: 1, kind: input, shape index: {}]   ;;  %s235_s2 = inlined_call_operand.vmem [shape: f32[1,128], index: 2, kind: input, shape index: {}]   ;;  %s236_s3 = inlined_call_operand.hbm [shape: f32[8,128], index: 3, kind: output, shape index: {}]  }
   0x1   :  { %9 = vsyncpa [#allocation6], 0 }
   0x2   :  { %10 = vsyncpa [#allocation4], 0  ;;  %s16_s14 = sshll.u32 %s233_s0, 4  ;;  %s196_s15 = smov [#allocation2]   ;;  %s17_s14 = int_to_ptr.hbm [resolvable:$true] %s16_s14 }
   0x3   :  { %s18_s16 = sshll.u32 %s196_s15, 4  ;;  %s26_s19 = sshll.u32 %s234_s1, 4  ;;  %s19_s16 = int_to_ptr.vmem [resolvable:$true] %s18_s16  ;;  %s27_s19 = int_to_ptr.hbm [resolvable:$true] %s26_s19 }
   0x4   :  { %21 = dma.hbm_to_vmem [thread:$0]  %s17_s14, 128, %s19_s16, [#allocation3]  }
   0x5   :  { %s197_s20 = smov [#allocation5]   ;;  %s198_s22 = smov 128  }
   0x6   :  { %s28_s21 = sshll.u32 %s197_s20, 4  ;;  %s199_s23 = smov 8   ;;  %s29_s21 = int_to_ptr.vmem [resolvable:$true] %s28_s21 }
   0x7   :  { %34 = dma.hbm_to_vmem [thread:$0]  %s27_s19, 512, %s29_s21, [#allocation6], %s198_s22, %s198_s22, %s199_s23  }
   0x8   :  { %190 = dma.done.wait [#allocation3], 128  }
   0x9   :  { %191 = vsyncadd [#allocation3], 4294967168 }
   0xa   :  { %192 = dma.done.wait [#allocation6], 512  }
   0xb   :  { %193 = vsyncadd [#allocation6], 4294966784  ;;  %v49_v0 = vld [vmem:[#allocation5 + $0x18] sm:$0xff]  ;;  %v48_v1 = vld [vmem:[#allocation5 + $0x10] sm:$0xff]  ;;  %vm54_vm0 = vcmask 261120   ;;  %s200_s24 = smov [#allocation7]  }
   0xc   :  { %70 = vmatpush.msra.mxu0 %v49_v0  ;;  %v47_v2 = vld [vmem:[#allocation5 + $0x8] sm:$0xff]  ;;  %v46_v3 = vld [vmem:[#allocation5] sm:$0xff]  ;;  %v45_v4 = vld [vmem:[#allocation2] sm:$0xff]  ;;  %s94_s25 = sshll.u32 %s200_s24, 4  ;;  %s96_s28 = sshll.u32 %s236_s3, 4  ;;  %s95_s25 = int_to_ptr.vmem [resolvable:$true] %s94_s25  ;;  %s97_s28 = int_to_ptr.hbm [resolvable:$true] %s96_s28 }
   0xd   :  { %v113_v5 = vld [vmem:[%s235_s2] ss:$0 sm:$0xff] }
   0xe   :  { %71 = vmatpush.msra.mxu0 %v48_v1 }
  0x10   :  { %72 = vmatpush.msra.mxu0 %v47_v2 }
  0x12   :  { %73 = vmatpush.msra.mxu0 %v46_v3 }
  0x13   :  { %107 = vmatmul.msk.f32.vlgmr.msra.gmra.mxu0 %vm54_vm0, %v45_v4 }
  0x90   :  { %v75_v6 = vpop.f32.mrf.mxu0 }
  0x91   :  { %v76_v7 = vadd.f32 %v113_v5, %v75_v6 }
  0x93   :  { %78 = vmax.xlane.f32.xlu0 %v76_v7 }
 0x106   :  { %v79_v8 = vpop.xlane.xlu0 %78 }
 0x107   :  { %v80_v9 = vsub.f32 %v76_v7, %v79_v8 }
 0x109   :  { %v81_v10 = vmul.f32 1.442695, %v80_v9 }
 0x10b   :  { %114 = vpow2.f32 %v81_v10 }
 0x111   :  { %v115_v11 = vpop.eup %114 }
 0x112   :  { %83 = vadd.xlane.f32.xlu0 %v115_v11 }
 0x185   :  { %v84_v12 = vpop.xlane.xlu0 %83 }
 0x186   :  { %116 = vlog2.f32 %v84_v12 }
 0x18c   :  { %v117_v13 = vpop.eup %116 }
 0x18d   :  { %v86_v14 = vmul.f32 0.6931472, %v117_v13 }
 0x18f   :  { %v87_v15 = vsub.f32 %v80_v9, %v86_v14 }
 0x191   :  { %88 = vst [vmem:[#allocation7] sm:$0xff] %v87_v15 }
 0x192   :  { %99 = dma.vmem_to_hbm [thread:$0]  %s95_s25, 128, %s97_s28, [#allocation4]  }
 0x193   :  { %194 = dma.done.wait [#allocation4], 128  }
 0x194   :  { %195 = vsyncadd [#allocation4], 4294967168 }
 0x195   :  { %104 = vsyncpa [#allocation3], 1 }
 0x196   :  { %105 = vsyncpa [#allocation6], 1 }
 0x197   :  { %106 = vsyncpa [#allocation4], 1 }

</bundles_post_ra>
